<compile_context>
chip_gen: v7x
topology: tpu7x:2x2x1
jax: 0.10.0
libtpu: 0.0.40
codegen_flags: <defaults>
</compile_context>

<pallas_src>
import functools

import jax
import jax.numpy as jnp
from jax.experimental import pallas as pl
from jax.experimental.pallas import tpu as pltpu

_LANE = 128      # last-dim tiling (lanes)
_SUBLANE = 8     # second-to-last-dim tiling (sublanes)


def _round_up(n, m):
    return ((n + m - 1) // m) * m


def _cdiv(a, b):
    return -(-a // b)


def _device_vmem_bytes():
    """Physical VMEM of the attached TPU; conservative fallback if unavailable."""
    try:
        return int(pltpu.get_tpu_info().vmem_capacity_bytes)
    except Exception:
        return 64 << 20  # v7x per-TensorCore VMEM (most restrictive generation)


# ----------------------------------------------------------------------------
# Fused 4-layer kernel (resident weights; the common / fast path)
# ----------------------------------------------------------------------------
def _mlp_kernel(x_ref, w1_ref, b1_ref, w2_ref, b2_ref,
                w2b_ref, b2b_ref, w3_ref, b3_ref, o_ref):
    cd = w1_ref.dtype  # compute dtype for MXU inputs (bf16 by default)
    # fc1 + ReLU (dropout p=0.0 -> identity); f32 accumulation on the MXU.
    h = jnp.dot(x_ref[...].astype(cd), w1_ref[...],
                preferred_element_type=jnp.float32)
    h = jnp.maximum(h + b1_ref[...], 0.0)
    # fc2 + ReLU
    h = jnp.dot(h.astype(cd), w2_ref[...], preferred_element_type=jnp.float32)
    h = jnp.maximum(h + b2_ref[...], 0.0)
    # fc2b + ReLU
    h = jnp.dot(h.astype(cd), w2b_ref[...], preferred_element_type=jnp.float32)
    h = jnp.maximum(h + b2b_ref[...], 0.0)
    # fc3 (no nonlinearity)
    out = jnp.dot(h.astype(cd), w3_ref[...], preferred_element_type=jnp.float32)
    out = out + b3_ref[...]
    o_ref[...] = out.astype(o_ref.dtype)


# ----------------------------------------------------------------------------
# K/N-tiled single-layer kernel (fallback for weights that exceed the VMEM budget)
# ----------------------------------------------------------------------------
def _linear_kernel(x_ref, w_ref, b_ref, o_ref, acc_ref, *, apply_relu):
    k = pl.program_id(2)

    @pl.when(k == 0)
    def _():
        acc_ref[...] = jnp.zeros_like(acc_ref)

    acc_ref[...] += jnp.dot(x_ref[...].astype(w_ref.dtype), w_ref[...],
                            preferred_element_type=jnp.float32)

    @pl.when(k == pl.num_programs(2) - 1)
    def _():
        r = acc_ref[...] + b_ref[...]
        if apply_relu:
            r = jnp.maximum(r, 0.0)
        o_ref[...] = r.astype(o_ref.dtype)


def _pick_tile(dim, max_tile, unit):
    """Largest tile <= max_tile that tiles `dim` (full-extent if dim is small)."""
    if dim <= max_tile:
        return dim
    t = max_tile - (max_tile % unit)
    while t >= unit:
        if dim % t == 0:
            return t
        t -= unit
    return dim  # no unit-multiple divisor: use full extent (always legal)


def _tiled_linear(x, w, b, *, apply_relu, out_dtype,
                  tm=512, tn_max=512, tk_max=1024):
    M, K = x.shape
    _, N = w.shape
    tm = max(_SUBLANE, _round_up(min(tm, _round_up(M, _SUBLANE)), _SUBLANE))
    M_p = _round_up(M, tm)
    xp = jnp.pad(x, ((0, M_p - M), (0, 0))) if M_p != M else x
    tn = _pick_tile(N, tn_max, _LANE)
    tk = _pick_tile(K, tk_max, _LANE)

    out = pl.pallas_call(
        functools.partial(_linear_kernel, apply_relu=apply_relu),
        out_shape=jax.ShapeDtypeStruct((M_p, N), out_dtype),
        grid_spec=pltpu.PrefetchScalarGridSpec(
            num_scalar_prefetch=0,
            grid=(M_p // tm, N // tn, K // tk),
            in_specs=[
                pl.BlockSpec((tm, tk), lambda i, j, k: (i, k)),   # activations
                pl.BlockSpec((tk, tn), lambda i, j, k: (k, j)),   # weight
                pl.BlockSpec((1, tn), lambda i, j, k: (0, j)),    # bias
            ],
            out_specs=pl.BlockSpec((tm, tn), lambda i, j, k: (i, j)),
            scratch_shapes=[pltpu.VMEM((tm, tn), jnp.float32)],
        ),
        compiler_params=pltpu.CompilerParams(
            dimension_semantics=("parallel", "parallel", "arbitrary")),
    )(xp, w, b)
    return out[:M] if M_p != M else out


def _forward_tiled(x, p, meta, out_dtype):
    cd = meta["compute_dtype"]
    h = _tiled_linear(x, p["w1"], p["b1"], apply_relu=True, out_dtype=cd)
    h = _tiled_linear(h, p["w2"], p["b2"], apply_relu=True, out_dtype=cd)
    h = _tiled_linear(h, p["w2b"], p["b2b"], apply_relu=True, out_dtype=cd)
    return _tiled_linear(h, p["w3"], p["b3"], apply_relu=False, out_dtype=out_dtype)


# ----------------------------------------------------------------------------
# Parameter preparation
# ----------------------------------------------------------------------------
def prepare_params(params, compute_dtype=jnp.bfloat16):
    """Pad only the hidden dim to a multiple of 128 and cast weights to compute_dtype.

    Zero padding keeps the math exact: padded hidden columns get zero weights and
    zero bias -> relu(0)=0 -> contribute nothing downstream. The input feature dim
    and the output dim are left at their true sizes (full-extent blocks are legal),
    so no wrapper-side slicing of the output is needed.
    """
    size_in, hidden = params["w1"].shape
    size_out = params["w3"].shape[1]
    hid_p = _round_up(hidden, _LANE)

    def pad_cols(a, cols):
        return jnp.pad(a, ((0, 0), (0, cols - a.shape[1])))

    def pad_rows(a, rows):
        return jnp.pad(a, ((0, rows - a.shape[0]), (0, 0)))

    prepared = {
        "w1": pad_cols(params["w1"], hid_p).astype(compute_dtype),
        "b1": pad_cols(params["b1"], hid_p).astype(jnp.float32),
        "w2": pad_cols(pad_rows(params["w2"], hid_p), hid_p).astype(compute_dtype),
        "b2": pad_cols(params["b2"], hid_p).astype(jnp.float32),
        "w2b": pad_cols(pad_rows(params["w2b"], hid_p), hid_p).astype(compute_dtype),
        "b2b": pad_cols(params["b2b"], hid_p).astype(jnp.float32),
        "w3": pad_rows(params["w3"], hid_p).astype(compute_dtype),
        "b3": params["b3"].astype(jnp.float32),
    }
    meta = {"size_in": size_in, "size_out": size_out, "hid_p": hid_p,
            "compute_dtype": compute_dtype}
    return prepared, meta


# ----------------------------------------------------------------------------
# Forward wrapper
# ----------------------------------------------------------------------------
def f_fully_connected_forward(x, prepared, meta, *, block_b=512, force_tiled=False):
    """x: [B, size_in]. prepared/meta from prepare_params(). Output dtype == x.dtype."""
    B, size_in = x.shape
    assert size_in == meta["size_in"]
    hid_p, size_out = meta["hid_p"], meta["size_out"]
    cd = meta["compute_dtype"]
    out_dtype = x.dtype

    cd_bytes = jnp.dtype(cd).itemsize
    x_bytes = jnp.dtype(x.dtype).itemsize
    out_bytes = jnp.dtype(out_dtype).itemsize

    device_vmem = _device_vmem_bytes()
    budget = device_vmem - (8 << 20)          # headroom for compiler internals

    # Resident (single-buffered) weights + biases, counted ONCE.
    w_bytes = (size_in * hid_p + 2 * hid_p * hid_p + hid_p * size_out) * cd_bytes
    b_bytes = (3 * hid_p + size_out) * 4

    def resident_need(bb):
        x_tile = bb * size_in * x_bytes        # double-buffered
        o_tile = bb * size_out * out_bytes     # double-buffered
        h_tmp = 3 * bb * hid_p * 4             # in-kernel f32/bf16 intermediates
        return w_bytes + b_bytes + 2 * (x_tile + o_tile) + h_tmp

    # Large-hidden fallback: resident weights do not fit -> per-layer K/N tiling.
    if force_tiled or resident_need(_SUBLANE) > budget:
        return _forward_tiled(x, prepared, meta, out_dtype)

    # Batch tile: multiple of 8 sublanes, at most the (rounded-up) batch, shrunk
    # if the VMEM budget demands it.
    block_b = max(_SUBLANE, _round_up(min(block_b, _round_up(B, _SUBLANE)), _SUBLANE))
    while resident_need(block_b) > budget and block_b > _SUBLANE:
        block_b = max(_SUBLANE, _round_up(block_b // 2, _SUBLANE))

    # Guarantee >=2 (and an even number of) batch tiles when B allows, so v7x's two
    # TensorCores both get work on the "parallel" axis (free on v5e/v6e).
    n_tiles = _cdiv(B, block_b)
    if n_tiles == 1 and B > 2 * _SUBLANE:
        n_tiles = 2
    elif n_tiles > 1 and n_tiles % 2:
        n_tiles += 1
    block_b = max(_SUBLANE, _round_up(_cdiv(B, n_tiles), _SUBLANE))
    B_p = block_b * n_tiles

    # Pad the batch only (no dtype cast, no feature-dim pad): the cast to the compute
    # dtype happens inside the kernel, saving an extra HBM pass over x.
    xp = jnp.pad(x, ((0, B_p - B), (0, 0))) if B_p != B else x

    need = resident_need(block_b)
    vmem_limit = int(min(budget, max(int(1.25 * need) + (4 << 20), 32 << 20)))

    const = lambda i: (0, 0)  # weights / biases: index-invariant -> DMA'd once

    def resident(shape):
        return pl.BlockSpec(shape, const, pipeline_mode=pl.Buffered(1))

    out = pl.pallas_call(
        _mlp_kernel,
        out_shape=jax.ShapeDtypeStruct((B_p, size_out), out_dtype),
        grid_spec=pltpu.PrefetchScalarGridSpec(
            num_scalar_prefetch=0,
            grid=(n_tiles,),
            in_specs=[
                pl.BlockSpec((block_b, size_in), lambda i: (i, 0)),  # x tile
                resident((size_in, hid_p)),   # w1 [in, hid]
                resident((1, hid_p)),         # b1
                resident((hid_p, hid_p)),     # w2
                resident((1, hid_p)),         # b2
                resident((hid_p, hid_p)),     # w2b
                resident((1, hid_p)),         # b2b
                resident((hid_p, size_out)),  # w3 [hid, out]
                resident((1, size_out)),      # b3
            ],
            out_specs=pl.BlockSpec((block_b, size_out), lambda i: (i, 0)),
        ),
        compiler_params=pltpu.CompilerParams(
            dimension_semantics=("parallel",),   # batch tiles shard across TCs on v7x
            vmem_limit_bytes=vmem_limit),
    )(xp, prepared["w1"], prepared["b1"], prepared["w2"], prepared["b2"],
      prepared["w2b"], prepared["b2b"], prepared["w3"], prepared["b3"])

    return out[:B] if B_p != B else out


# ----------------------------------------------------------------------------
# Synthetic init + references
# ----------------------------------------------------------------------------
def init_params(key, size_in, size, channels_hidden=None, dtype=jnp.float32):
    """Deterministic synthetic init (PyTorch Linear shapes, stored transposed [in,out])."""
    if not channels_hidden:
        channels_hidden = 2 * size
    ks = jax.random.split(key, 8)

    def linear(kw, kb, fan_in, fan_out):
        bound = 1.0 / jnp.sqrt(fan_in)
        w = jax.random.uniform(kw, (fan_in, fan_out), dtype, -bound, bound)
        b = jax.random.uniform(kb, (1, fan_out), dtype, -bound, bound)
        return w, b

    w1, b1 = linear(ks[0], ks[1], size_in, channels_hidden)
    w2, b2 = linear(ks[2], ks[3], channels_hidden, channels_hidden)
    w2b, b2b = linear(ks[4], ks[5], channels_hidden, channels_hidden)
    w3, b3 = linear(ks[6], ks[7], channels_hidden, size)
    return {"w1": w1, "b1": b1, "w2": w2, "b2": b2,
            "w2b": w2b, "b2b": b2b, "w3": w3, "b3": b3}


def reference_forward(x, p):
    """Pure-f32 reference (matches the PyTorch module numerics)."""
    h = jnp.maximum(x @ p["w1"] + p["b1"], 0.0)
    h = jnp.maximum(h @ p["w2"] + p["b2"], 0.0)
    h = jnp.maximum(h @ p["w2b"] + p["b2b"], 0.0)
    return h @ p["w3"] + p["b3"]


def reference_forward_mixed(x, p, compute_dtype):
    """Reference applying the same low-precision-input / f32-accumulate casts."""
    cd = compute_dtype

    def dot(a, w):
        return jnp.dot(a.astype(cd), w.astype(cd), preferred_element_type=jnp.float32)

    h = jnp.maximum(dot(x, p["w1"]) + p["b1"], 0.0)
    h = jnp.maximum(dot(h, p["w2"]) + p["b2"], 0.0)
    h = jnp.maximum(dot(h, p["w2b"]) + p["b2b"], 0.0)
    return dot(h, p["w3"]) + p["b3"]


if __name__ == "__main__":
    key = jax.random.PRNGKey(0)
    k_x, k_p = jax.random.split(key)

    B, size_in, size = 8, 32, 16          # channels_hidden defaults to 2*size = 32
    x = jax.random.normal(k_x, (B, size_in), dtype=jnp.float32)
    params = init_params(k_p, size_in, size)

    # --- Default bf16 compute path ------------------------------------------------
    prepared, meta = prepare_params(params, compute_dtype=jnp.bfloat16)
    out = jax.block_until_ready(f_fully_connected_forward(x, prepared, meta))
    assert out.shape == (B, size) and out.dtype == x.dtype

    ref_mixed = reference_forward_mixed(x, params, jnp.bfloat16)
    assert jnp.allclose(out, ref_mixed, atol=1e-2, rtol=1e-2), "mismatch vs mixed ref"
    ref32 = reference_forward(x, params)
    assert jnp.allclose(out, ref32, atol=2e-1, rtol=2e-1), "mismatch vs f32 reference"

    # --- f32 compute path (numerics parity with the PyTorch module) ----------------
    prepared32, meta32 = prepare_params(params, compute_dtype=jnp.float32)
    out32 = jax.block_until_ready(f_fully_connected_forward(x, prepared32, meta32))
    assert jnp.allclose(out32, ref32, atol=1e-2, rtol=1e-2), "mismatch on f32 path"

    # --- Tiled / padded-batch path (B not a multiple of block_b, even tile count) --
    B2 = 600
    x2 = jax.random.normal(k_x, (B2, size_in), dtype=jnp.float32)
    out2 = jax.block_until_ready(
        f_fully_connected_forward(x2, prepared, meta, block_b=512))
    ref2 = reference_forward_mixed(x2, params, jnp.bfloat16)
    assert out2.shape == (B2, size)
    assert jnp.allclose(out2, ref2, atol=1e-2, rtol=1e-2), "mismatch on tiled batch"

    # --- Large-hidden fallback path (K/N-tiled per-layer kernels), forced ----------
    out3 = jax.block_until_ready(
        f_fully_connected_forward(x2, prepared, meta, force_tiled=True))
    assert out3.shape == (B2, size)
    assert jnp.allclose(out3, ref2, atol=1e-2, rtol=1e-2), "mismatch on tiled fallback"

    print("KERNEL_OK")
</pallas_src>

<mosaic_0001>
module attributes {stable_mosaic.version = 11 : i64} {
  func.func @_mlp_kernel(%arg0: i32, %arg1: memref<8x32xf32, #tpu.memory_space<vmem>>, %arg2: memref<32x128xbf16, #tpu.memory_space<vmem>>, %arg3: memref<1x128xf32, #tpu.memory_space<vmem>>, %arg4: memref<128x128xbf16, #tpu.memory_space<vmem>>, %arg5: memref<1x128xf32, #tpu.memory_space<vmem>>, %arg6: memref<128x128xbf16, #tpu.memory_space<vmem>>, %arg7: memref<1x128xf32, #tpu.memory_space<vmem>>, %arg8: memref<128x16xbf16, #tpu.memory_space<vmem>>, %arg9: memref<1x16xf32, #tpu.memory_space<vmem>>, %arg10: memref<8x16xf32, #tpu.memory_space<vmem>>) attributes {dimension_semantics = [#tpu.dimension_semantics<parallel>], iteration_bounds = array<i64: 1>, scalar_prefetch = 0 : i64, scratch_operands = 0 : i64, tpu.core_type = #tpu.core_type<tc>, window_params = [{transform_indices = @transform_0, window_bounds = array<i64: 8, 32>}, {pipeline_mode = #tpu.pipeline_mode<synchronous>, transform_indices = @transform_1, window_bounds = array<i64: 32, 128>}, {pipeline_mode = #tpu.pipeline_mode<synchronous>, transform_indices = @transform_2, window_bounds = array<i64: 1, 128>}, {pipeline_mode = #tpu.pipeline_mode<synchronous>, transform_indices = @transform_3, window_bounds = array<i64: 128, 128>}, {pipeline_mode = #tpu.pipeline_mode<synchronous>, transform_indices = @transform_4, window_bounds = array<i64: 1, 128>}, {pipeline_mode = #tpu.pipeline_mode<synchronous>, transform_indices = @transform_5, window_bounds = array<i64: 128, 128>}, {pipeline_mode = #tpu.pipeline_mode<synchronous>, transform_indices = @transform_6, window_bounds = array<i64: 1, 128>}, {pipeline_mode = #tpu.pipeline_mode<synchronous>, transform_indices = @transform_7, window_bounds = array<i64: 128, 16>}, {pipeline_mode = #tpu.pipeline_mode<synchronous>, transform_indices = @transform_8, window_bounds = array<i64: 1, 16>}, {transform_indices = @transform_9, window_bounds = array<i64: 8, 16>}]} {
    %c0 = arith.constant 0 : index
    %c0_0 = arith.constant 0 : index
    %0 = vector.load %arg1[%c0, %c0_0] : memref<8x32xf32, #tpu.memory_space<vmem>>, vector<8x32xf32>
    %1 = arith.truncf %0 : vector<8x32xf32> to vector<8x32xbf16>
    %c0_1 = arith.constant 0 : index
    %c0_2 = arith.constant 0 : index
    %2 = vector.load %arg2[%c0_1, %c0_2] : memref<32x128xbf16, #tpu.memory_space<vmem>>, vector<32x128xbf16>
    %cst = arith.constant dense<0.000000e+00> : vector<8x128xf32>
    %3 = tpu.matmul %1, %2, %cst {dimension_numbers = #tpu.dot_dimension_numbers<[1], [0], [0], [1], [0, 0, 1, 1], [], []>} : vector<8x32xbf16>, vector<32x128xbf16>, vector<8x128xf32> -> vector<8x128xf32>
    %c0_3 = arith.constant 0 : index
    %c0_4 = arith.constant 0 : index
    %4 = vector.load %arg3[%c0_3, %c0_4] : memref<1x128xf32, #tpu.memory_space<vmem>>, vector<1x128xf32>
    %5 = vector.broadcast %4 : vector<1x128xf32> to vector<8x128xf32>
    %6 = arith.addf %3, %5 : vector<8x128xf32>
    %cst_5 = arith.constant 0.000000e+00 : f32
    %7 = vector.broadcast %cst_5 : f32 to vector<8x128xf32>
    %8 = arith.maximumf %6, %7 : vector<8x128xf32>
    %9 = arith.truncf %8 : vector<8x128xf32> to vector<8x128xbf16>
    %c0_6 = arith.constant 0 : index
    %c0_7 = arith.constant 0 : index
    %10 = vector.load %arg4[%c0_6, %c0_7] : memref<128x128xbf16, #tpu.memory_space<vmem>>, vector<128x128xbf16>
    %cst_8 = arith.constant dense<0.000000e+00> : vector<8x128xf32>
    %11 = tpu.matmul %9, %10, %cst_8 {dimension_numbers = #tpu.dot_dimension_numbers<[1], [0], [0], [1], [0, 0, 1, 1], [], []>} : vector<8x128xbf16>, vector<128x128xbf16>, vector<8x128xf32> -> vector<8x128xf32>
    %c0_9 = arith.constant 0 : index
    %c0_10 = arith.constant 0 : index
    %12 = vector.load %arg5[%c0_9, %c0_10] : memref<1x128xf32, #tpu.memory_space<vmem>>, vector<1x128xf32>
    %13 = vector.broadcast %12 : vector<1x128xf32> to vector<8x128xf32>
    %14 = arith.addf %11, %13 : vector<8x128xf32>
    %cst_11 = arith.constant 0.000000e+00 : f32
    %15 = vector.broadcast %cst_11 : f32 to vector<8x128xf32>
    %16 = arith.maximumf %14, %15 : vector<8x128xf32>
    %17 = arith.truncf %16 : vector<8x128xf32> to vector<8x128xbf16>
    %c0_12 = arith.constant 0 : index
    %c0_13 = arith.constant 0 : index
    %18 = vector.load %arg6[%c0_12, %c0_13] : memref<128x128xbf16, #tpu.memory_space<vmem>>, vector<128x128xbf16>
    %cst_14 = arith.constant dense<0.000000e+00> : vector<8x128xf32>
    %19 = tpu.matmul %17, %18, %cst_14 {dimension_numbers = #tpu.dot_dimension_numbers<[1], [0], [0], [1], [0, 0, 1, 1], [], []>} : vector<8x128xbf16>, vector<128x128xbf16>, vector<8x128xf32> -> vector<8x128xf32>
    %c0_15 = arith.constant 0 : index
    %c0_16 = arith.constant 0 : index
    %20 = vector.load %arg7[%c0_15, %c0_16] : memref<1x128xf32, #tpu.memory_space<vmem>>, vector<1x128xf32>
    %21 = vector.broadcast %20 : vector<1x128xf32> to vector<8x128xf32>
    %22 = arith.addf %19, %21 : vector<8x128xf32>
    %cst_17 = arith.constant 0.000000e+00 : f32
    %23 = vector.broadcast %cst_17 : f32 to vector<8x128xf32>
    %24 = arith.maximumf %22, %23 : vector<8x128xf32>
    %25 = arith.truncf %24 : vector<8x128xf32> to vector<8x128xbf16>
    %c0_18 = arith.constant 0 : index
    %c0_19 = arith.constant 0 : index
    %26 = vector.load %arg8[%c0_18, %c0_19] : memref<128x16xbf16, #tpu.memory_space<vmem>>, vector<128x16xbf16>
    %cst_20 = arith.constant dense<0.000000e+00> : vector<8x16xf32>
    %27 = tpu.matmul %25, %26, %cst_20 {dimension_numbers = #tpu.dot_dimension_numbers<[1], [0], [0], [1], [0, 0, 1, 1], [], []>} : vector<8x128xbf16>, vector<128x16xbf16>, vector<8x16xf32> -> vector<8x16xf32>
    %c0_21 = arith.constant 0 : index
    %c0_22 = arith.constant 0 : index
    %28 = vector.load %arg9[%c0_21, %c0_22] : memref<1x16xf32, #tpu.memory_space<vmem>>, vector<1x16xf32>
    %29 = vector.broadcast %28 : vector<1x16xf32> to vector<8x16xf32>
    %30 = arith.addf %27, %29 : vector<8x16xf32>
    %c0_23 = arith.constant 0 : index
    %c0_24 = arith.constant 0 : index
    %31 = vector.load %arg10[%c0_23, %c0_24] : memref<8x16xf32, #tpu.memory_space<vmem>>, vector<8x16xf32>
    tpu.vector_store %arg10[%c0_23, %c0_24], %30 {strides = array<i32>} : memref<8x16xf32, #tpu.memory_space<vmem>>, vector<8x16xf32>,
    return
  }
  func.func @transform_0(%arg0: i32) -> (i32, i32) {
    %c0_i32 = arith.constant 0 : i32
    %c0_i32_0 = arith.constant 0 : i32
    return %arg0, %c0_i32 : i32, i32
  }
  func.func @transform_1(%arg0: i32) -> (i32, i32) {
    %c0_i32 = arith.constant 0 : i32
    %c0_i32_0 = arith.constant 0 : i32
    %c0_i32_1 = arith.constant 0 : i32
    return %c0_i32, %c0_i32_0 : i32, i32
  }
  func.func @transform_2(%arg0: i32) -> (i32, i32) {
    %c0_i32 = arith.constant 0 : i32
    %c0_i32_0 = arith.constant 0 : i32
    %c0_i32_1 = arith.constant 0 : i32
    return %c0_i32, %c0_i32_0 : i32, i32
  }
  func.func @transform_3(%arg0: i32) -> (i32, i32) {
    %c0_i32 = arith.constant 0 : i32
    %c0_i32_0 = arith.constant 0 : i32
    %c0_i32_1 = arith.constant 0 : i32
    return %c0_i32, %c0_i32_0 : i32, i32
  }
  func.func @transform_4(%arg0: i32) -> (i32, i32) {
    %c0_i32 = arith.constant 0 : i32
    %c0_i32_0 = arith.constant 0 : i32
    %c0_i32_1 = arith.constant 0 : i32
    return %c0_i32, %c0_i32_0 : i32, i32
  }
  func.func @transform_5(%arg0: i32) -> (i32, i32) {
    %c0_i32 = arith.constant 0 : i32
    %c0_i32_0 = arith.constant 0 : i32
    %c0_i32_1 = arith.constant 0 : i32
    return %c0_i32, %c0_i32_0 : i32, i32
  }
  func.func @transform_6(%arg0: i32) -> (i32, i32) {
    %c0_i32 = arith.constant 0 : i32
    %c0_i32_0 = arith.constant 0 : i32
    %c0_i32_1 = arith.constant 0 : i32
    return %c0_i32, %c0_i32_0 : i32, i32
  }
  func.func @transform_7(%arg0: i32) -> (i32, i32) {
    %c0_i32 = arith.constant 0 : i32
    %c0_i32_0 = arith.constant 0 : i32
    %c0_i32_1 = arith.constant 0 : i32
    return %c0_i32, %c0_i32_0 : i32, i32
  }
  func.func @transform_8(%arg0: i32) -> (i32, i32) {
    %c0_i32 = arith.constant 0 : i32
    %c0_i32_0 = arith.constant 0 : i32
    %c0_i32_1 = arith.constant 0 : i32
    return %c0_i32, %c0_i32_0 : i32, i32
  }
  func.func @transform_9(%arg0: i32) -> (i32, i32) {
    %c0_i32 = arith.constant 0 : i32
    %c0_i32_0 = arith.constant 0 : i32
    return %arg0, %c0_i32 : i32, i32
  }
}

</mosaic_0001>

<bundles_post_ra>
// kernel: tpu_custom_call.1
= control target key start
LH: loop header
LB: loop body
LE: loop exit
PB: predicated region body
PF: predicated region fallthrough
CT: control target
= control target key end

     0   :  { %14 = vsyncpa [#allocation3], 0  ;;  %s920_s0 = inlined_call_operand.hbm [shape: f32[8,32], index: 0, kind: input, shape index: {}]   ;;  %s921_s1 = inlined_call_operand.vmem [shape: bf16[32,128], index: 1, kind: input, shape index: {}]   ;;  %s922_s2 = inlined_call_operand.vmem [shape: f32[1,128], index: 2, kind: input, shape index: {}]   ;;  %s923_s3 = inlined_call_operand.vmem [shape: bf16[128,128], index: 3, kind: input, shape index: {}]   ;;  %s924_s4 = inlined_call_operand.vmem [shape: f32[1,128], index: 4, kind: input, shape index: {}]   ;;  %s925_s5 = inlined_call_operand.hbm [shape: bf16[128,128], index: 5, kind: input, shape index: {}]   ;;  %s926_s6 = inlined_call_operand.vmem [shape: f32[1,128], index: 6, kind: input, shape index: {}]   ;;  %s927_s7 = inlined_call_operand.vmem [shape: bf16[128,16], index: 7, kind: input, shape index: {}]   ;;  %s928_s8 = inlined_call_operand.vmem [shape: f32[1,16], index: 8, kind: input, shape index: {}]   ;;  %s929_s9 = inlined_call_operand.hbm [shape: f32[8,16], index: 9, kind: output, shape index: {}]  }
   0x1   :  { %15 = vsyncpa [#allocation6], 0 }
   0x2   :  { %16 = vsyncpa [#allocation4], 0  ;;  %s720_s30 = smov [#allocation2]   ;;  %s721_s11 = smov [#allocation5]  }
   0x3   :  { %s23_s10 = sshll.u32 %s720_s30, 4  ;;  %s40_s12 = sshll.u32 %s721_s11, 4  ;;  %s24_s10 = int_to_ptr.vmem [resolvable:$true] %s23_s10  ;;  %s777_s12 = int_to_ptr.vmem [resolvable:$true] %s40_s12 }
   0x4   :  { %s648_s15 = scalar_lea.hbm %s920_s0, 128 }
   0x5   :  { %p649_p0 = scmp.ne.s32.totalorder %s920_s0, %s648_s15  ;;  %p652_p1 = scmp.lt.u32.totalorder %s648_s15, %s920_s0 }
   0x7   :  { %p654_p2 = pnand %p652_p1, %p649_p0 }
   0x9   :  { %657 = shalt.err (!%p654_p2)
}
   0xa   :  { %s658_s20 = scalar_lea.vmem %s24_s10, 128  ;;  %p663_p4 = scmp.lt.s32.totalorder %s24_s10, %s24_s10 }
   0xb   :  { %p659_p3 = scmp.ne.s32.totalorder %s24_s10, %s658_s20  ;;  %p664_p5 = scmp.lt.s32.totalorder %s658_s20, %s658_s20 }
   0xd   :  { %p665_p6 = por %p664_p5, %p663_p4 }
   0xf   :  { %p666_p7 = pnand %p665_p6, %p659_p3 }
  0x11   :  { %669 = shalt.err (!%p666_p7)
}
  0x12   :  { %26 = dma.hbm_to_vmem [thread:$0]  %s920_s0, 128, %s24_s10, [#allocation3]  }
  0x13   :  { %s670_s25 = scalar_lea.hbm %s925_s5, 1024 }
  0x14   :  { %p671_p8 = scmp.ne.s32.totalorder %s925_s5, %s670_s25  ;;  %p674_p9 = scmp.lt.u32.totalorder %s670_s25, %s925_s5 }
  0x16   :  { %p676_p10 = pnand %p674_p9, %p671_p8 }
  0x18   :  { %679 = shalt.err (!%p676_p10)
}
  0x19   :  { %s680_s30 = scalar_lea.vmem %s777_s12, 1024  ;;  %p685_p12 = scmp.lt.s32.totalorder %s777_s12, %s777_s12 }
  0x1a   :  { %p681_p11 = scmp.ne.s32.totalorder %s777_s12, %s680_s30  ;;  %p686_p13 = scmp.lt.s32.totalorder %s680_s30, %s680_s30 }
  0x1c   :  { %p687_p0 = por %p686_p13, %p685_p12 }
  0x1e   :  { %p688_p1 = pnand %p687_p0, %p681_p11 }
  0x20   :  { %691 = shalt.err (!%p688_p1)
}
  0x21   :  { %s722_s0 = smov 64   ;;  %s723_s10 = smov 4  }
  0x22   :  { %46 = dma.hbm_to_vmem [thread:$0]  %s925_s5, 1024, %s777_s12, [#allocation6], %s722_s0, %s722_s0, %s723_s10  }
  0x23   :  { %714 = dma.done.wait [#allocation3], 128  }
  0x24   :  { %715 = vsyncadd [#allocation3], 4294967168 }
  0x25   :  { %716 = dma.done.wait [#allocation6], 1024  }
  0x26   :  { %717 = vsyncadd [#allocation6], 4294966272  ;;  %v724_v0 = vmov 0.0   ;;  %vm725_vm0 = vmmov 0   ;;  %v622_v1 = vld [vmem:[%s921_s1] sm:$0xff]   ;;  %v623_v2 = vld [vmem:[%s921_s1 + $0x8] sm:$0xff]  }
  0x27   :  { %547 = vmatprep.subr.bf16.mxu0 %v724_v0  ;;  %551 = vmatprep.mubr.msk.bf16.mxu0 %vm725_vm0, %v724_v0  ;;  %v60_v3 = vld [vmem:[#allocation2] sm:$0xff]  ;;  %v625_v6 = vld [vmem:[%s923_s3 + $0x8] sm:$0xff]   ;;  %vm85_vm1 = vcmask 261120   ;;  %v626_v7 = vld [vmem:[%s923_s3 + $0x10] sm:$0xff]   ;;  %s726_s28 = smov [#allocation7]   ;;  %vm468_vm2 = vcmask 130048  }
  0x28   :  { %555 = vmatprep.subr.bf16.mxu1 %v724_v0  ;;  %571 = vmatprep.mubr.msk.bf16.mxu1 %vm725_vm0, %v724_v0  ;;  %v624_v4 = vld [vmem:[%s923_s3] sm:$0xff]   ;;  %v61_v5 = vpack.c.bf16 %v60_v3, %v60_v3  ;;  %v627_v8 = vld [vmem:[%s923_s3 + $0x18] sm:$0xff]   ;;  %v629_v10 = vld [vmem:[%s923_s3 + $0x28] sm:$0xff]   ;;  %s476_s29 = sshll.u32 %s726_s28, 4  ;;  %s477_s29 = int_to_ptr.vmem [resolvable:$true] %s476_s29 }
  0x29   :  { %548 = vmatpush3.bf16.msra.mxu0 %v622_v1  ;;  %556 = vmatpush3.bf16.msra.mxu1 %v624_v4  ;;  %v628_v9 = vld [vmem:[%s923_s3 + $0x20] sm:$0xff]   ;;  %v630_v11 = vld [vmem:[%s923_s3 + $0x30] sm:$0xff]   ;;  %v631_v12 = vld [vmem:[%s923_s3 + $0x38] sm:$0xff]   ;;  %p697_p3 = scmp.lt.s32.totalorder %s477_s29, %s477_s29 }
  0x2a   :  { %549 = vmatprep.subr.bf16.mxu0 %v724_v0  ;;  %557 = vmatprep.subr.bf16.mxu1 %v724_v0  ;;  %v632_v13 = vld [vmem:[#allocation5] sm:$0xff]   ;;  %v633_v14 = vld [vmem:[#allocation5 + $0x8] sm:$0xff]   ;;  %v634_v15 = vld [vmem:[#allocation5 + $0x10] sm:$0xff]  }
  0x2b   :  { %v635_v16 = vld [vmem:[#allocation5 + $0x18] sm:$0xff]   ;;  %v636_v17 = vld [vmem:[#allocation5 + $0x20] sm:$0xff]   ;;  %v637_v18 = vld [vmem:[#allocation5 + $0x28] sm:$0xff]  }
  0x2c   :  { %v486_v19 = vld [vmem:[%s922_s2] ss:$0 sm:$0xff]  ;;  %v638_v27 = vld [vmem:[#allocation5 + $0x30] sm:$0xff]   ;;  %v641_v30 = vld [vmem:[%s927_s7 + $0x8] sm:$0xff]  }
  0x2d   :  { %550 = vmatpush3.bf16.msra.mxu0 %v623_v2  ;;  %558 = vmatpush3.bf16.msra.mxu1 %v625_v6  ;;  %v639_v28 = vld [vmem:[#allocation5 + $0x38] sm:$0xff]   ;;  %v642_v31 = vld [vmem:[%s927_s7 + $0x10] sm:$0xff]   ;;  %v643_v32 = vld [vmem:[%s927_s7 + $0x18] sm:$0xff]  }
  0x2e   :  { %575 = vmatprep.subr.bf16.mxu0 %v724_v0  ;;  %559 = vmatprep.subr.bf16.mxu1 %v724_v0  ;;  %v640_v29 = vld [vmem:[%s927_s7] sm:$0xff]   ;;  %v645_v34 = vld [vmem:[%s927_s7 + $0x28] sm:$0xff]   ;;  %v646_v43 = vld [vmem:[%s927_s7 + $0x30] sm:$0xff]  }
  0x2f   :  { %v644_v33 = vld [vmem:[%s927_s7 + $0x20] sm:$0xff]   ;;  %v647_v44 = vld [vmem:[%s927_s7 + $0x38] sm:$0xff]  }
  0x30   :  { %552 = vmatmul.mubr.msk.bf16.vlgmr.msra.gmra.mrb[0].mxu0 %vm85_vm1, %v61_v5  ;;  %v490_v35 = vld [vmem:[%s924_s4] ss:$0 sm:$0xff] }
  0x31   :  { %591 = vmatprep.mubr.msk.bf16.mxu0 %vm725_vm0, %v724_v0  ;;  %560 = vmatpush3.bf16.msra.mxu1 %v626_v7  ;;  %v499_v45 = vld [vmem:[%s926_s6] ss:$0 sm:$0xff]  ;;  %s692_s6 = scalar_lea.vmem %s477_s29, 128 }
  0x32   :  { %561 = vmatprep.subr.bf16.mxu1 %v724_v0  ;;  %576 = vmatpush3.bf16.msra.mxu0 %v632_v13  ;;  %v508_v53 = vld [vmem:[%s928_s8] ss:$0 sm:$0xff]  ;;  %p693_p2 = scmp.ne.s32.totalorder %s477_s29, %s692_s6  ;;  %p698_p4 = scmp.lt.s32.totalorder %s692_s6, %s692_s6 }
  0x33   :  { %577 = vmatprep.subr.bf16.mxu0 %v724_v0 }
  0x34   :  { %p699_p5 = por %p698_p4, %p697_p3 }
  0x35   :  { %562 = vmatpush3.bf16.msra.mxu1 %v627_v8 }
  0x36   :  { %563 = vmatprep.subr.bf16.mxu1 %v724_v0  ;;  %578 = vmatpush3.bf16.msra.mxu0 %v633_v14  ;;  %p700_p6 = pnand %p699_p5, %p693_p2 }
  0x37   :  { %579 = vmatprep.subr.bf16.mxu0 %v724_v0 }
  0x39   :  { %564 = vmatpush3.bf16.msra.mxu1 %v628_v9 }
  0x3a   :  { %565 = vmatprep.subr.bf16.mxu1 %v724_v0  ;;  %580 = vmatpush3.bf16.msra.mxu0 %v634_v15 }
  0x3b   :  { %581 = vmatprep.subr.bf16.mxu0 %v724_v0 }
  0x3d   :  { %566 = vmatpush3.bf16.msra.mxu1 %v629_v10 }
  0x3e   :  { %567 = vmatprep.subr.bf16.mxu1 %v724_v0  ;;  %582 = vmatpush3.bf16.msra.mxu0 %v635_v16 }
  0x3f   :  { %583 = vmatprep.subr.bf16.mxu0 %v724_v0 }
  0x41   :  { %568 = vmatpush3.bf16.msra.mxu1 %v630_v11 }
  0x42   :  { %569 = vmatprep.subr.bf16.mxu1 %v724_v0  ;;  %584 = vmatpush3.bf16.msra.mxu0 %v636_v17 }
  0x43   :  { %585 = vmatprep.subr.bf16.mxu0 %v724_v0 }
  0x45   :  { %570 = vmatpush3.bf16.msra.mxu1 %v631_v12 }
  0x46   :  { %595 = vmatprep.subr.bf16.mxu1 %v724_v0  ;;  %586 = vmatpush3.bf16.msra.mxu0 %v637_v18 }
  0x47   :  { %587 = vmatprep.subr.bf16.mxu0 %v724_v0 }
  0x4a   :  { %588 = vmatpush3.bf16.msra.mxu0 %v638_v27 }
  0x4b   :  { %589 = vmatprep.subr.bf16.mxu0 %v724_v0 }
  0x4e   :  { %590 = vmatpush3.bf16.msra.mxu0 %v639_v28 }
 0x103   :  { %v123_v20 = vpop.f32.mrb[0].mxu0 }
 0x104   :  { %v124_v21 = vadd.f32 %v486_v19, %v123_v20  ;;  %v553_v22 = vpop.f32.mrb[1].mxu0 }
 0x105   :  { %v126_v23 = vpop.f32.mrb[2].mxu0 }
 0x106   :  { %v129_v24 = vmax.f32 %v124_v21, 0.0  ;;  %v554_v25 = vpop.f32.mrb[3].mxu0 }
 0x108   :  { %v130_v26 = vpack.c.bf16 %v129_v24, %v129_v24 }
 0x10a   :  { %572 = vmatmul.mubr.bf16.vlgmr.msra.gmra.mrb[0].mxu1 %v130_v26 }
 0x10b   :  { %611 = vmatprep.mubr.msk.bf16.mxu1 %vm725_vm0, %v724_v0  ;;  %596 = vmatpush3.bf16.msra.mxu1 %v640_v29 }
 0x10c   :  { %597 = vmatprep.subr.bf16.mxu1 %v724_v0 }
 0x10f   :  { %598 = vmatpush3.bf16.msra.mxu1 %v641_v30 }
 0x110   :  { %599 = vmatprep.subr.bf16.mxu1 %v724_v0 }
 0x113   :  { %600 = vmatpush3.bf16.msra.mxu1 %v642_v31 }
 0x114   :  { %601 = vmatprep.subr.bf16.mxu1 %v724_v0 }
 0x117   :  { %602 = vmatpush3.bf16.msra.mxu1 %v643_v32 }
 0x118   :  { %603 = vmatprep.subr.bf16.mxu1 %v724_v0 }
 0x11b   :  { %604 = vmatpush3.bf16.msra.mxu1 %v644_v33 }
 0x11c   :  { %605 = vmatprep.subr.bf16.mxu1 %v724_v0 }
 0x11f   :  { %606 = vmatpush3.bf16.msra.mxu1 %v645_v34 }
 0x120   :  { %607 = vmatprep.subr.bf16.mxu1 %v724_v0 }
 0x123   :  { %608 = vmatpush3.bf16.msra.mxu1 %v646_v43 }
 0x124   :  { %609 = vmatprep.subr.bf16.mxu1 %v724_v0 }
 0x127   :  { %610 = vmatpush3.bf16.msra.mxu1 %v647_v44 }
 0x1dd   :  { %v236_v36 = vpop.f32.mrb[0].mxu1 }
 0x1de   :  { %v237_v37 = vadd.f32 %v490_v35, %v236_v36  ;;  %v573_v38 = vpop.f32.mrb[1].mxu1 }
 0x1df   :  { %v239_v39 = vpop.f32.mrb[2].mxu1 }
 0x1e0   :  { %v242_v40 = vmax.f32 %v237_v37, 0.0  ;;  %v574_v41 = vpop.f32.mrb[3].mxu1 }
 0x1e2   :  { %v243_v42 = vpack.c.bf16 %v242_v40, %v242_v40 }
 0x1e4   :  { %592 = vmatmul.mubr.bf16.vlgmr.msra.gmra.mrb[4].mxu0 %v243_v42 }
 0x2b7   :  { %v349_v46 = vpop.f32.mrb[4].mxu0 }
 0x2b8   :  { %v350_v47 = vadd.f32 %v499_v45, %v349_v46  ;;  %v593_v48 = vpop.f32.mrb[5].mxu0 }
 0x2b9   :  { %v352_v49 = vpop.f32.mrb[6].mxu0 }
 0x2ba   :  { %v355_v50 = vmax.f32 %v350_v47, 0.0  ;;  %v594_v51 = vpop.f32.mrb[7].mxu0 }
 0x2bc   :  { %v356_v52 = vpack.c.bf16 %v355_v50, %v355_v50 }
 0x2be   :  { %612 = vmatmul.mubr.bf16.vlgmr.msra.gmra.mrb[4].mxu1 %v356_v52 }
 0x391   :  { %v462_v54 = vpop.f32.mrb[4].mxu1 }
 0x392   :  { %v463_v55 = vadd.f32 %v508_v53, %v462_v54  ;;  %v613_v56 = vpop.f32.mrb[5].mxu1 }
 0x393   :  { %v465_v57 = vpop.f32.mrb[6].mxu1 }
 0x394   :  { %v614_v58 = vpop.f32.mrb[7].mxu1  ;;  %469 = vst.msk [vmem:[#allocation7] sm:$0xff] %vm468_vm2, %v463_v55 }
 0x395   :  { %703 = shalt.err (!%p700_p6)
}
 0x396   :  { %s704_s8 = scalar_lea.hbm %s929_s9, 128 }
 0x397   :  { %p705_p7 = scmp.ne.s32.totalorder %s929_s9, %s704_s8  ;;  %p708_p8 = scmp.lt.u32.totalorder %s704_s8, %s929_s9 }
 0x399   :  { %p710_p9 = pnand %p708_p8, %p705_p7 }
 0x39b   :  { %713 = shalt.err (!%p710_p9)
}
 0x39c   :  { %479 = dma.vmem_to_hbm [thread:$0]  %s477_s29, 128, %s929_s9, [#allocation4]  }
 0x39d   :  { %718 = dma.done.wait [#allocation4], 128  }
 0x39e   :  { %719 = vsyncadd [#allocation4], 4294967168 }
 0x39f   :  { %483 = vsyncpa [#allocation3], 1 }
 0x3a0   :  { %484 = vsyncpa [#allocation6], 1 }
 0x3a1   :  { %485 = vsyncpa [#allocation4], 1 }

</bundles_post_ra>
